<compile_context>
chip_gen: v7x
topology: tpu7x:2x2x1
jax: 0.10.0
libtpu: 0.0.40
codegen_flags: <defaults>
</compile_context>

<pallas_src>
import math
import functools

import jax
import jax.numpy as jnp
from jax.experimental import pallas as pl
from jax.experimental.pallas import tpu as pltpu

_INV_SQRT2 = 0.7071067811865476
_LN_EPS = 1e-5

# rows of the packed projection parameter-vector slab (5, C)
_LN_W, _LN_B, _BQ, _BK, _BV = range(5)
# slabs of the packed projection weight array (3, C, C), stored (C_in, C_out)
_WQ, _WK, _WV = range(3)
# rows of the packed output/FFN parameter-vector slab (5, C)
_BO, _LN2_W, _LN2_B, _B1, _B2 = range(5)
# slabs of the packed output/FFN weight array (3, C, C)
_WO, _W1, _W2 = range(3)


def _layer_norm(x, w, b):
    mean = jnp.mean(x, axis=-1, keepdims=True)
    var = jnp.mean((x - mean) ** 2, axis=-1, keepdims=True)
    return (x - mean) * jax.lax.rsqrt(var + _LN_EPS) * w + b


def _gelu_exact(x):
    return 0.5 * x * (1.0 + jax.lax.erf(x * _INV_SQRT2))


def _mm(a, b, mm_dtype):
    """Matmul with f32 accumulation; operands optionally cast to bf16 for MXU rate."""
    if mm_dtype == jnp.float32:
        # TODO(synk): at production C pin precision=jax.lax.Precision.HIGHEST for the f32
        # path (default TPU matmul precision may drift past 1e-4 for long contractions).
        return jnp.dot(a, b, preferred_element_type=jnp.float32)
    return jnp.dot(a.astype(mm_dtype), b.astype(mm_dtype),
                   preferred_element_type=jnp.float32)


# --------------------------- kernel 1: LN + Q/K/V projections ----------------------------
def _proj_kernel(q_ref, k_ref, v_ref, w_ref, vec_ref, q_out, k_out, v_out, *, mm_dtype):
    ln_w = vec_ref[_LN_W]
    ln_b = vec_ref[_LN_B]
    q_out[...] = (_mm(_layer_norm(q_ref[...], ln_w, ln_b), w_ref[_WQ], mm_dtype)
                  + vec_ref[_BQ]).astype(q_out.dtype)
    k_out[...] = (_mm(_layer_norm(k_ref[...], ln_w, ln_b), w_ref[_WK], mm_dtype)
                  + vec_ref[_BK]).astype(k_out.dtype)
    v_out[...] = (_mm(_layer_norm(v_ref[...], ln_w, ln_b), w_ref[_WV], mm_dtype)
                  + vec_ref[_BV]).astype(v_out.dtype)


# --------------------------- kernel 2: per-batch multi-head attention --------------------
def _attn_kernel(q_ref, k_ref, v_ref, ctx_ref, *, n_heads, mm_dtype):
    _, L, C = q_ref.shape
    dh = C // n_heads
    scale = 1.0 / math.sqrt(dh)
    if mm_dtype == jnp.float32:
        Q, K, V = q_ref[0], k_ref[0], v_ref[0]
    else:
        Q, K, V = (q_ref[0].astype(mm_dtype), k_ref[0].astype(mm_dtype),
                   v_ref[0].astype(mm_dtype))
    dn_qk = (((1,), (1,)), ((), ()))  # contract head dim; no K transpose materialized
    # Heads: static unroll over a compile-time-constant head count.  Each head's s/p/o die
    # at the ref store below and there is no cross-head accumulator (the full-depth W_o
    # matmul lives in the row-tiled output kernel), so the live set stays bounded.
    # TODO(synk): for production L (hundreds+) tile KV flash-style (online softmax) and/or
    # move heads onto a grid axis instead of materializing the (L, L) score tensor.
    for h in range(n_heads):
        sl = slice(h * dh, (h + 1) * dh)
        s = jax.lax.dot_general(Q[:, sl], K[:, sl], dn_qk,
                                preferred_element_type=jnp.float32) * scale   # (L, L) f32
        s = s - jnp.max(s, axis=-1, keepdims=True)
        p = jnp.exp(s)
        d = jnp.sum(p, axis=-1, keepdims=True)
        if mm_dtype == jnp.float32:
            r = pl.reciprocal(d)                 # exact: keeps the tight f32 check tight
        else:
            r = pl.reciprocal(d, approx=True)    # EUP slot, co-issues with MXU/VPU work
            r = r * (2.0 - d * r)                # one Newton step -> ~f32 accuracy
        o = _mm(p * r, V[:, sl], mm_dtype)       # (L, dh) f32
        ctx_ref[0, :, sl] = o.astype(ctx_ref.dtype)


# --------------------------- kernel 3: W_o + residual + FFN ------------------------------
def _out_kernel(ctx_ref, qres_ref, w_ref, vec_ref, o_ref, *, mm_dtype):
    # Single full-depth (K = C) output projection over the lane-concatenated head contexts
    # (replaces the per-head K=dh matmul + accumulate of the previous kernel).
    attn = _mm(ctx_ref[...], w_ref[_WO], mm_dtype) + vec_ref[_BO]
    x = attn + qres_ref[...]                      # residual with the pre-LN query rows
    y = _layer_norm(x, vec_ref[_LN2_W], vec_ref[_LN2_B])
    y = _mm(y, w_ref[_W1], mm_dtype) + vec_ref[_B1]
    y = _gelu_exact(y)
    y = _mm(y, w_ref[_W2], mm_dtype) + vec_ref[_B2]
    o_ref[...] = (y + x).astype(o_ref.dtype)


# --------------------------- wrapper ------------------------------------------------------
def _row_tile(n_rows):
    """Per-generation row tile: v7x (64 MiB VMEM) -> 256 rows, v5e/v6e (128 MiB) -> 512."""
    vmem = 128 * 1024 * 1024
    try:
        vmem = int(getattr(pltpu.get_tpu_info(), "vmem_capacity_bytes", vmem))
    except Exception:
        pass
    tile = 256 if vmem <= 64 * 1024 * 1024 else 512
    return min(n_rows, tile)


def _compiler_params(sems, *vmem_bytes):
    # Explicit VMEM budget (double-buffered blocks + headroom) instead of the scoped default.
    est = 2 * int(sum(vmem_bytes)) + (1 << 20)
    limit = max(8 << 20, min(est, 32 << 20))
    return pltpu.CompilerParams(dimension_semantics=sems, vmem_limit_bytes=limit)


def cross_attention_pallas(q, k, v, params, n_heads, *, mm_dtype=jnp.bfloat16):
    """q, k, v: (B, C, L) float32, exactly like the PyTorch module's inputs.

    mm_dtype: matmul-operand dtype (accumulation is always f32).  bf16 is the MXU-native
    fast path; pass jnp.float32 for bit-tighter numerics.
    """
    B, C, L = q.shape
    assert C % n_heads == 0
    R = B * L
    f32 = jnp.float32

    # Lane-dense row layout: one wrapper-side swapaxes per tensor (layout plumbing, not
    # compute), so every kernel block is (rows, C) with channels dense on the lane axis.
    q_rows = jnp.swapaxes(q, 1, 2).reshape(R, C)
    k_rows = jnp.swapaxes(k, 1, 2).reshape(R, C)
    v_rows = jnp.swapaxes(v, 1, 2).reshape(R, C)

    w_qkv = jnp.stack([params["wq"], params["wk"], params["wv"]], axis=0)      # (3, C, C)
    vec_qkv = jnp.stack([params["ln_w"], params["ln_b"],
                         params["bq"], params["bk"], params["bv"]], axis=0)    # (5, C)
    w_out = jnp.stack([params["wo"], params["w1"], params["w2"]], axis=0)      # (3, C, C)
    vec_out = jnp.stack([params["bo"], params["ln2_w"], params["ln2_b"],
                         params["b1"], params["b2"]], axis=0)                  # (5, C)

    tr = _row_tile(R)
    n_tiles = pl.cdiv(R, tr)
    row_spec = pl.BlockSpec((tr, C), lambda i: (i, 0))
    # Weight/bias slabs: constant block index -> fetched once, not re-DMAed per row tile.
    # TODO(synk): single-buffer these slabs (pipeline_mode) once C is large enough for the
    # duplicated copy to matter inside v7x's 64 MiB VMEM.
    wmat_spec = pl.BlockSpec((3, C, C), lambda i: (0, 0, 0))
    wvec_spec = pl.BlockSpec((5, C), lambda i: (0, 0))

    row_bytes = tr * C * 4
    wmat_bytes = 3 * C * C * 4
    wvec_bytes = 5 * C * 4

    # --- kernel 1: shared LayerNorm + Q/K/V projections, tiled over B*L rows -------------
    q_proj, k_proj, v_proj = pl.pallas_call(
        functools.partial(_proj_kernel, mm_dtype=mm_dtype),
        out_shape=(jax.ShapeDtypeStruct((R, C), f32),) * 3,
        grid=(n_tiles,),
        in_specs=[row_spec, row_spec, row_spec, wmat_spec, wvec_spec],
        out_specs=(row_spec, row_spec, row_spec),
        compiler_params=_compiler_params(("parallel",),
                                         6 * row_bytes, wmat_bytes, wvec_bytes),
    )(q_rows, k_rows, v_rows, w_qkv, vec_qkv)

    # --- kernel 2: per-batch multi-head softmax attention -> head contexts ---------------
    batch_spec = pl.BlockSpec((1, L, C), lambda b: (b, 0, 0))
    ctx = pl.pallas_call(
        functools.partial(_attn_kernel, n_heads=n_heads, mm_dtype=mm_dtype),
        out_shape=jax.ShapeDtypeStruct((B, L, C), f32),
        grid=(B,),
        in_specs=[batch_spec, batch_spec, batch_spec],
        out_specs=batch_spec,
        compiler_params=_compiler_params(("parallel",),
                                         4 * L * C * 4, n_heads * L * L * 4),
    )(q_proj.reshape(B, L, C), k_proj.reshape(B, L, C), v_proj.reshape(B, L, C))

    # --- kernel 3: W_o + residual + LayerNorm + FFN (+ residual), tiled over B*L rows ----
    out_rows = pl.pallas_call(
        functools.partial(_out_kernel, mm_dtype=mm_dtype),
        out_shape=jax.ShapeDtypeStruct((R, C), q.dtype),
        grid=(n_tiles,),
        in_specs=[row_spec, row_spec, wmat_spec, wvec_spec],
        out_specs=row_spec,
        compiler_params=_compiler_params(("parallel",),
                                         5 * row_bytes, wmat_bytes, wvec_bytes),
    )(ctx.reshape(R, C), q_rows, w_out, vec_out)

    # back to the module's native (B, C, L) output layout (wrapper-side swapaxes)
    return jnp.swapaxes(out_rows.reshape(B, L, C), 1, 2)


# --------------------------- plain-JAX reference (PyTorch semantics) ---------------------
def cross_attention_ref(q, k, v, params, n_heads):
    qs = jnp.swapaxes(q, 1, 2)
    ks = jnp.swapaxes(k, 1, 2)
    vs = jnp.swapaxes(v, 1, 2)
    ln_w, ln_b = params["ln_w"], params["ln_b"]
    q_ln = _layer_norm(qs, ln_w, ln_b)
    k_ln = _layer_norm(ks, ln_w, ln_b)
    v_ln = _layer_norm(vs, ln_w, ln_b)
    Q = q_ln @ params["wq"] + params["bq"]
    K = k_ln @ params["wk"] + params["bk"]
    V = v_ln @ params["wv"] + params["bv"]
    B, L, C = Q.shape
    dh = C // n_heads
    Qh = Q.reshape(B, L, n_heads, dh).transpose(0, 2, 1, 3)
    Kh = K.reshape(B, L, n_heads, dh).transpose(0, 2, 1, 3)
    Vh = V.reshape(B, L, n_heads, dh).transpose(0, 2, 1, 3)
    s = jnp.einsum("bhqd,bhkd->bhqk", Qh, Kh) / math.sqrt(dh)
    p = jax.nn.softmax(s, axis=-1)
    attn = jnp.einsum("bhqk,bhkd->bhqd", p, Vh).transpose(0, 2, 1, 3).reshape(B, L, C)
    attn = attn @ params["wo"] + params["bo"]
    x = attn + qs
    y = _layer_norm(x, params["ln2_w"], params["ln2_b"])
    y = y @ params["w1"] + params["b1"]
    y = _gelu_exact(y)
    y = y @ params["w2"] + params["b2"]
    out = y + x
    return jnp.swapaxes(out, 1, 2).reshape(-1, C, L)


def init_params(key, channels):
    C = channels
    keys = jax.random.split(key, 8)
    s = 1.0 / math.sqrt(C)
    return {
        "ln_w": jnp.ones((C,), jnp.float32),
        "ln_b": jnp.zeros((C,), jnp.float32),
        # MHA in_proj split into q/k/v, stored pre-transposed as (C_in, C_out).
        "wq": jax.random.normal(keys[0], (C, C), jnp.float32) * s,
        "bq": jax.random.normal(keys[1], (C,), jnp.float32) * 0.02,
        "wk": jax.random.normal(keys[2], (C, C), jnp.float32) * s,
        "bk": jnp.zeros((C,), jnp.float32),
        "wv": jax.random.normal(keys[3], (C, C), jnp.float32) * s,
        "bv": jnp.zeros((C,), jnp.float32),
        "wo": jax.random.normal(keys[4], (C, C), jnp.float32) * s,
        "bo": jnp.zeros((C,), jnp.float32),
        "ln2_w": jnp.ones((C,), jnp.float32),
        "ln2_b": jnp.zeros((C,), jnp.float32),
        "w1": jax.random.normal(keys[5], (C, C), jnp.float32) * s,
        "b1": jax.random.normal(keys[6], (C,), jnp.float32) * 0.02,
        "w2": jax.random.normal(keys[7], (C, C), jnp.float32) * s,
        "b2": jnp.zeros((C,), jnp.float32),
    }


if __name__ == "__main__":
    B, C, L, H = 2, 32, 16, 2  # batch, channels, size (seq len), n_heads
    key = jax.random.PRNGKey(0)
    kq, kk, kv, kp = jax.random.split(key, 4)
    q = jax.random.normal(kq, (B, C, L), jnp.float32)
    k = jax.random.normal(kk, (B, C, L), jnp.float32)
    v = jax.random.normal(kv, (B, C, L), jnp.float32)
    params = init_params(kp, C)

    ref = cross_attention_ref(q, k, v, params, H)

    # f32-operand mode: tight numerics check against the plain-JAX reference.
    out_f32 = jax.block_until_ready(
        cross_attention_pallas(q, k, v, params, H, mm_dtype=jnp.float32))
    assert out_f32.shape == (B, C, L), out_f32.shape
    assert jnp.allclose(out_f32, ref, atol=1e-4, rtol=1e-4), "f32 kernel mismatch vs reference"

    # bf16-operand (MXU-native) fast path: deliberately looser tolerance per review.
    out_bf16 = jax.block_until_ready(cross_attention_pallas(q, k, v, params, H))
    assert out_bf16.shape == (B, C, L), out_bf16.shape
    assert jnp.allclose(out_bf16, ref, atol=5e-2, rtol=5e-2), "bf16 kernel mismatch vs reference"

    print("KERNEL_OK")
</pallas_src>

<mosaic_0001>
module attributes {stable_mosaic.version = 11 : i64} {
  func.func @_proj_kernel(%arg0: i32, %arg1: memref<32x32xf32, #tpu.memory_space<vmem>>, %arg2: memref<32x32xf32, #tpu.memory_space<vmem>>, %arg3: memref<32x32xf32, #tpu.memory_space<vmem>>, %arg4: memref<3x32x32xf32, #tpu.memory_space<vmem>>, %arg5: memref<5x32xf32, #tpu.memory_space<vmem>>, %arg6: memref<32x32xf32, #tpu.memory_space<vmem>>, %arg7: memref<32x32xf32, #tpu.memory_space<vmem>>, %arg8: memref<32x32xf32, #tpu.memory_space<vmem>>) attributes {dimension_semantics = [#tpu.dimension_semantics<parallel>], iteration_bounds = array<i64: 1>, scalar_prefetch = 0 : i64, scratch_operands = 0 : i64, tpu.core_type = #tpu.core_type<tc>, window_params = [{transform_indices = @transform_0, window_bounds = array<i64: 32, 32>}, {transform_indices = @transform_1, window_bounds = array<i64: 32, 32>}, {transform_indices = @transform_2, window_bounds = array<i64: 32, 32>}, {pipeline_mode = #tpu.pipeline_mode<synchronous>, transform_indices = @transform_3, window_bounds = array<i64: 3, 32, 32>}, {pipeline_mode = #tpu.pipeline_mode<synchronous>, transform_indices = @transform_4, window_bounds = array<i64: 5, 32>}, {transform_indices = @transform_5, window_bounds = array<i64: 32, 32>}, {transform_indices = @transform_6, window_bounds = array<i64: 32, 32>}, {transform_indices = @transform_7, window_bounds = array<i64: 32, 32>}]} {
    %c0 = arith.constant 0 : index
    %c0_0 = arith.constant 0 : index
    %0 = vector.load %arg5[%c0, %c0_0] : memref<5x32xf32, #tpu.memory_space<vmem>>, vector<1x32xf32>
    %1 = vector.shape_cast %0 : vector<1x32xf32> to vector<32xf32>
    %c1 = arith.constant 1 : index
    %c0_1 = arith.constant 0 : index
    %2 = vector.load %arg5[%c1, %c0_1] : memref<5x32xf32, #tpu.memory_space<vmem>>, vector<1x32xf32>
    %3 = vector.shape_cast %2 : vector<1x32xf32> to vector<32xf32>
    %c0_2 = arith.constant 0 : index
    %c0_3 = arith.constant 0 : index
    %4 = vector.load %arg1[%c0_2, %c0_3] : memref<32x32xf32, #tpu.memory_space<vmem>>, vector<32x32xf32>
    %cst = arith.constant dense<0.000000e+00> : vector<32xf32>
    %5 = vector.multi_reduction <add>, %4, %cst [1] : vector<32x32xf32> to vector<32xf32>
    %6 = vector.shape_cast %5 : vector<32xf32> to vector<32x1xf32>
    %cst_4 = arith.constant 3.200000e+01 : f32
    %7 = vector.broadcast %cst_4 : f32 to vector<32x1xf32>
    %8 = arith.divf %6, %7 : vector<32x1xf32>
    %9 = vector.broadcast %8 : vector<32x1xf32> to vector<32x32xf32>
    %10 = arith.subf %4, %9 : vector<32x32xf32>
    %11 = arith.mulf %10, %10 : vector<32x32xf32>
    %cst_5 = arith.constant dense<0.000000e+00> : vector<32xf32>
    %12 = vector.multi_reduction <add>, %11, %cst_5 [1] : vector<32x32xf32> to vector<32xf32>
    %13 = vector.shape_cast %12 : vector<32xf32> to vector<32x1xf32>
    %cst_6 = arith.constant 3.200000e+01 : f32
    %14 = vector.broadcast %cst_6 : f32 to vector<32x1xf32>
    %15 = arith.divf %13, %14 : vector<32x1xf32>
    %16 = vector.broadcast %8 : vector<32x1xf32> to vector<32x32xf32>
    %17 = arith.subf %4, %16 : vector<32x32xf32>
    %cst_7 = arith.constant 9.99999974E-6 : f32
    %18 = vector.broadcast %cst_7 : f32 to vector<32x1xf32>
    %19 = arith.addf %15, %18 : vector<32x1xf32>
    %20 = math.rsqrt %19 : vector<32x1xf32>
    %21 = vector.broadcast %20 : vector<32x1xf32> to vector<32x32xf32>
    %22 = arith.mulf %17, %21 : vector<32x32xf32>
    %23 = vector.shape_cast %1 : vector<32xf32> to vector<1x32xf32>
    %24 = vector.broadcast %23 : vector<1x32xf32> to vector<32x32xf32>
    %25 = arith.mulf %22, %24 : vector<32x32xf32>
    %26 = vector.shape_cast %3 : vector<32xf32> to vector<1x32xf32>
    %27 = vector.broadcast %26 : vector<1x32xf32> to vector<32x32xf32>
    %28 = arith.addf %25, %27 : vector<32x32xf32>
    %c0_8 = arith.constant 0 : index
    %c0_9 = arith.constant 0 : index
    %c0_10 = arith.constant 0 : index
    %29 = vector.load %arg4[%c0_8, %c0_9, %c0_10] : memref<3x32x32xf32, #tpu.memory_space<vmem>>, vector<1x32x32xf32>
    %30 = vector.shape_cast %29 : vector<1x32x32xf32> to vector<32x32xf32>
    %cst_11 = arith.constant dense<0.000000e+00> : vector<32x32xf32>
    %31 = tpu.matmul %28, %30, %cst_11 {dimension_numbers = #tpu.dot_dimension_numbers<[1], [0], [0], [1], [0, 0, 1, 1], [], []>} : vector<32x32xf32>, vector<32x32xf32>, vector<32x32xf32> -> vector<32x32xf32>
    %c2 = arith.constant 2 : index
    %c0_12 = arith.constant 0 : index
    %32 = vector.load %arg5[%c2, %c0_12] : memref<5x32xf32, #tpu.memory_space<vmem>>, vector<1x32xf32>
    %33 = vector.shape_cast %32 : vector<1x32xf32> to vector<32xf32>
    %34 = vector.shape_cast %33 : vector<32xf32> to vector<1x32xf32>
    %35 = vector.broadcast %34 : vector<1x32xf32> to vector<32x32xf32>
    %36 = arith.addf %31, %35 : vector<32x32xf32>
    %c0_13 = arith.constant 0 : index
    %c0_14 = arith.constant 0 : index
    %37 = vector.load %arg6[%c0_13, %c0_14] : memref<32x32xf32, #tpu.memory_space<vmem>>, vector<32x32xf32>
    tpu.vector_store %arg6[%c0_13, %c0_14], %36 {strides = array<i32>} : memref<32x32xf32, #tpu.memory_space<vmem>>, vector<32x32xf32>,
    %c0_15 = arith.constant 0 : index
    %c0_16 = arith.constant 0 : index
    %38 = vector.load %arg2[%c0_15, %c0_16] : memref<32x32xf32, #tpu.memory_space<vmem>>, vector<32x32xf32>
    %cst_17 = arith.constant dense<0.000000e+00> : vector<32xf32>
    %39 = vector.multi_reduction <add>, %38, %cst_17 [1] : vector<32x32xf32> to vector<32xf32>
    %40 = vector.shape_cast %39 : vector<32xf32> to vector<32x1xf32>
    %cst_18 = arith.constant 3.200000e+01 : f32
    %41 = vector.broadcast %cst_18 : f32 to vector<32x1xf32>
    %42 = arith.divf %40, %41 : vector<32x1xf32>
    %43 = vector.broadcast %42 : vector<32x1xf32> to vector<32x32xf32>
    %44 = arith.subf %38, %43 : vector<32x32xf32>
    %45 = arith.mulf %44, %44 : vector<32x32xf32>
    %cst_19 = arith.constant dense<0.000000e+00> : vector<32xf32>
    %46 = vector.multi_reduction <add>, %45, %cst_19 [1] : vector<32x32xf32> to vector<32xf32>
    %47 = vector.shape_cast %46 : vector<32xf32> to vector<32x1xf32>
    %cst_20 = arith.constant 3.200000e+01 : f32
    %48 = vector.broadcast %cst_20 : f32 to vector<32x1xf32>
    %49 = arith.divf %47, %48 : vector<32x1xf32>
    %50 = vector.broadcast %42 : vector<32x1xf32> to vector<32x32xf32>
    %51 = arith.subf %38, %50 : vector<32x32xf32>
    %cst_21 = arith.constant 9.99999974E-6 : f32
    %52 = vector.broadcast %cst_21 : f32 to vector<32x1xf32>
    %53 = arith.addf %49, %52 : vector<32x1xf32>
    %54 = math.rsqrt %53 : vector<32x1xf32>
    %55 = vector.broadcast %54 : vector<32x1xf32> to vector<32x32xf32>
    %56 = arith.mulf %51, %55 : vector<32x32xf32>
    %57 = vector.shape_cast %1 : vector<32xf32> to vector<1x32xf32>
    %58 = vector.broadcast %57 : vector<1x32xf32> to vector<32x32xf32>
    %59 = arith.mulf %56, %58 : vector<32x32xf32>
    %60 = vector.shape_cast %3 : vector<32xf32> to vector<1x32xf32>
    %61 = vector.broadcast %60 : vector<1x32xf32> to vector<32x32xf32>
    %62 = arith.addf %59, %61 : vector<32x32xf32>
    %c1_22 = arith.constant 1 : index
    %c0_23 = arith.constant 0 : index
    %c0_24 = arith.constant 0 : index
    %63 = vector.load %arg4[%c1_22, %c0_23, %c0_24] : memref<3x32x32xf32, #tpu.memory_space<vmem>>, vector<1x32x32xf32>
    %64 = vector.shape_cast %63 : vector<1x32x32xf32> to vector<32x32xf32>
    %cst_25 = arith.constant dense<0.000000e+00> : vector<32x32xf32>
    %65 = tpu.matmul %62, %64, %cst_25 {dimension_numbers = #tpu.dot_dimension_numbers<[1], [0], [0], [1], [0, 0, 1, 1], [], []>} : vector<32x32xf32>, vector<32x32xf32>, vector<32x32xf32> -> vector<32x32xf32>
    %c3 = arith.constant 3 : index
    %c0_26 = arith.constant 0 : index
    %66 = vector.load %arg5[%c3, %c0_26] : memref<5x32xf32, #tpu.memory_space<vmem>>, vector<1x32xf32>
    %67 = vector.shape_cast %66 : vector<1x32xf32> to vector<32xf32>
    %68 = vector.shape_cast %67 : vector<32xf32> to vector<1x32xf32>
    %69 = vector.broadcast %68 : vector<1x32xf32> to vector<32x32xf32>
    %70 = arith.addf %65, %69 : vector<32x32xf32>
    %c0_27 = arith.constant 0 : index
    %c0_28 = arith.constant 0 : index
    %71 = vector.load %arg7[%c0_27, %c0_28] : memref<32x32xf32, #tpu.memory_space<vmem>>, vector<32x32xf32>
    tpu.vector_store %arg7[%c0_27, %c0_28], %70 {strides = array<i32>} : memref<32x32xf32, #tpu.memory_space<vmem>>, vector<32x32xf32>,
    %c0_29 = arith.constant 0 : index
    %c0_30 = arith.constant 0 : index
    %72 = vector.load %arg3[%c0_29, %c0_30] : memref<32x32xf32, #tpu.memory_space<vmem>>, vector<32x32xf32>
    %cst_31 = arith.constant dense<0.000000e+00> : vector<32xf32>
    %73 = vector.multi_reduction <add>, %72, %cst_31 [1] : vector<32x32xf32> to vector<32xf32>
    %74 = vector.shape_cast %73 : vector<32xf32> to vector<32x1xf32>
    %cst_32 = arith.constant 3.200000e+01 : f32
    %75 = vector.broadcast %cst_32 : f32 to vector<32x1xf32>
    %76 = arith.divf %74, %75 : vector<32x1xf32>
    %77 = vector.broadcast %76 : vector<32x1xf32> to vector<32x32xf32>
    %78 = arith.subf %72, %77 : vector<32x32xf32>
    %79 = arith.mulf %78, %78 : vector<32x32xf32>
    %cst_33 = arith.constant dense<0.000000e+00> : vector<32xf32>
    %80 = vector.multi_reduction <add>, %79, %cst_33 [1] : vector<32x32xf32> to vector<32xf32>
    %81 = vector.shape_cast %80 : vector<32xf32> to vector<32x1xf32>
    %cst_34 = arith.constant 3.200000e+01 : f32
    %82 = vector.broadcast %cst_34 : f32 to vector<32x1xf32>
    %83 = arith.divf %81, %82 : vector<32x1xf32>
    %84 = vector.broadcast %76 : vector<32x1xf32> to vector<32x32xf32>
    %85 = arith.subf %72, %84 : vector<32x32xf32>
    %cst_35 = arith.constant 9.99999974E-6 : f32
    %86 = vector.broadcast %cst_35 : f32 to vector<32x1xf32>
    %87 = arith.addf %83, %86 : vector<32x1xf32>
    %88 = math.rsqrt %87 : vector<32x1xf32>
    %89 = vector.broadcast %88 : vector<32x1xf32> to vector<32x32xf32>
    %90 = arith.mulf %85, %89 : vector<32x32xf32>
    %91 = vector.shape_cast %1 : vector<32xf32> to vector<1x32xf32>
    %92 = vector.broadcast %91 : vector<1x32xf32> to vector<32x32xf32>
    %93 = arith.mulf %90, %92 : vector<32x32xf32>
    %94 = vector.shape_cast %3 : vector<32xf32> to vector<1x32xf32>
    %95 = vector.broadcast %94 : vector<1x32xf32> to vector<32x32xf32>
    %96 = arith.addf %93, %95 : vector<32x32xf32>
    %c2_36 = arith.constant 2 : index
    %c0_37 = arith.constant 0 : index
    %c0_38 = arith.constant 0 : index
    %97 = vector.load %arg4[%c2_36, %c0_37, %c0_38] : memref<3x32x32xf32, #tpu.memory_space<vmem>>, vector<1x32x32xf32>
    %98 = vector.shape_cast %97 : vector<1x32x32xf32> to vector<32x32xf32>
    %cst_39 = arith.constant dense<0.000000e+00> : vector<32x32xf32>
    %99 = tpu.matmul %96, %98, %cst_39 {dimension_numbers = #tpu.dot_dimension_numbers<[1], [0], [0], [1], [0, 0, 1, 1], [], []>} : vector<32x32xf32>, vector<32x32xf32>, vector<32x32xf32> -> vector<32x32xf32>
    %c4 = arith.constant 4 : index
    %c0_40 = arith.constant 0 : index
    %100 = vector.load %arg5[%c4, %c0_40] : memref<5x32xf32, #tpu.memory_space<vmem>>, vector<1x32xf32>
    %101 = vector.shape_cast %100 : vector<1x32xf32> to vector<32xf32>
    %102 = vector.shape_cast %101 : vector<32xf32> to vector<1x32xf32>
    %103 = vector.broadcast %102 : vector<1x32xf32> to vector<32x32xf32>
    %104 = arith.addf %99, %103 : vector<32x32xf32>
    %c0_41 = arith.constant 0 : index
    %c0_42 = arith.constant 0 : index
    %105 = vector.load %arg8[%c0_41, %c0_42] : memref<32x32xf32, #tpu.memory_space<vmem>>, vector<32x32xf32>
    tpu.vector_store %arg8[%c0_41, %c0_42], %104 {strides = array<i32>} : memref<32x32xf32, #tpu.memory_space<vmem>>, vector<32x32xf32>,
    return
  }
  func.func @transform_0(%arg0: i32) -> (i32, i32) {
    %c0_i32 = arith.constant 0 : i32
    %c0_i32_0 = arith.constant 0 : i32
    return %arg0, %c0_i32 : i32, i32
  }
  func.func @transform_1(%arg0: i32) -> (i32, i32) {
    %c0_i32 = arith.constant 0 : i32
    %c0_i32_0 = arith.constant 0 : i32
    return %arg0, %c0_i32 : i32, i32
  }
  func.func @transform_2(%arg0: i32) -> (i32, i32) {
    %c0_i32 = arith.constant 0 : i32
    %c0_i32_0 = arith.constant 0 : i32
    return %arg0, %c0_i32 : i32, i32
  }
  func.func @transform_3(%arg0: i32) -> (i32, i32, i32) {
    %c0_i32 = arith.constant 0 : i32
    %c0_i32_0 = arith.constant 0 : i32
    %c0_i32_1 = arith.constant 0 : i32
    %c0_i32_2 = arith.constant 0 : i32
    return %c0_i32, %c0_i32_0, %c0_i32_1 : i32, i32, i32
  }
  func.func @transform_4(%arg0: i32) -> (i32, i32) {
    %c0_i32 = arith.constant 0 : i32
    %c0_i32_0 = arith.constant 0 : i32
    %c0_i32_1 = arith.constant 0 : i32
    return %c0_i32, %c0_i32_0 : i32, i32
  }
  func.func @transform_5(%arg0: i32) -> (i32, i32) {
    %c0_i32 = arith.constant 0 : i32
    %c0_i32_0 = arith.constant 0 : i32
    return %arg0, %c0_i32 : i32, i32
  }
  func.func @transform_6(%arg0: i32) -> (i32, i32) {
    %c0_i32 = arith.constant 0 : i32
    %c0_i32_0 = arith.constant 0 : i32
    return %arg0, %c0_i32 : i32, i32
  }
  func.func @transform_7(%arg0: i32) -> (i32, i32) {
    %c0_i32 = arith.constant 0 : i32
    %c0_i32_0 = arith.constant 0 : i32
    return %arg0, %c0_i32 : i32, i32
  }
}

</mosaic_0001>

<bundles_post_ra>
// kernel: tpu_custom_call.1
= control target key start
LH: loop header
LB: loop body
LE: loop exit
PB: predicated region body
PF: predicated region fallthrough
CT: control target
= control target key end

     0   :  { %13 = vsyncpa [#allocation3], 0  ;;  %s1314_s0 = inlined_call_operand.hbm [shape: f32[32,32], index: 0, kind: input, shape index: {}]   ;;  %s1315_s1 = inlined_call_operand.hbm [shape: f32[32,32], index: 1, kind: input, shape index: {}]   ;;  %s1316_s2 = inlined_call_operand.hbm [shape: f32[32,32], index: 2, kind: input, shape index: {}]   ;;  %s1317_s3 = inlined_call_operand.hbm [shape: f32[3,32,32], index: 3, kind: input, shape index: {}]   ;;  %s1318_s4 = inlined_call_operand.vmem [shape: f32[5,32], index: 4, kind: input, shape index: {}]   ;;  %s1319_s5 = inlined_call_operand.hbm [shape: f32[32,32], index: 5, kind: output, shape index: {0}]   ;;  %s1320_s6 = inlined_call_operand.hbm [shape: f32[32,32], index: 6, kind: output, shape index: {1}]   ;;  %s1321_s7 = inlined_call_operand.hbm [shape: f32[32,32], index: 7, kind: output, shape index: {2}]  }
   0x1   :  { %14 = vsyncpa [#allocation6], 0 }
   0x2   :  { %15 = vsyncpa [#allocation9], 0 }
   0x3   :  { %16 = vsyncpa [#allocation4], 0 }
   0x4   :  { %17 = vsyncpa [#allocation12], 0  ;;  %s974_s24 = smov [#allocation5]   ;;  %s975_s26 = smov [#allocation2]  }
   0x5   :  { %s35_s25 = sshll.u32 %s974_s24, 4  ;;  %s23_s27 = sshll.u32 %s975_s26, 4  ;;  %s36_s25 = int_to_ptr.vmem [resolvable:$true] %s35_s25  ;;  %s1023_s27 = int_to_ptr.vmem [resolvable:$true] %s23_s27 }
   0x6   :  { %s810_s30 = scalar_lea.hbm %s1315_s1, 512 }
   0x7   :  { %p811_p0 = scmp.ne.s32.totalorder %s1315_s1, %s810_s30  ;;  %p814_p1 = scmp.lt.u32.totalorder %s810_s30, %s1315_s1 }
   0x9   :  { %p816_p2 = pnand %p814_p1, %p811_p0 }
   0xb   :  { %819 = shalt.err (!%p816_p2)
}
   0xc   :  { %s820_s12 = scalar_lea.vmem %s36_s25, 512  ;;  %p825_p4 = scmp.lt.s32.totalorder %s36_s25, %s36_s25 }
   0xd   :  { %p821_p3 = scmp.ne.s32.totalorder %s36_s25, %s820_s12  ;;  %p826_p5 = scmp.lt.s32.totalorder %s820_s12, %s820_s12 }
   0xf   :  { %p827_p6 = por %p826_p5, %p825_p4 }
  0x11   :  { %p828_p7 = pnand %p827_p6, %p821_p3 }
  0x13   :  { %831 = shalt.err (!%p828_p7)
}
  0x14   :  { %s976_s13 = smov 128   ;;  %s977_s14 = smov 8  }
  0x15   :  { %41 = dma.hbm_to_vmem [thread:$0]  %s1315_s1, 512, %s36_s25, [#allocation6], %s976_s13, %s976_s13, %s977_s14  }
  0x16   :  { %s832_s19 = scalar_lea.hbm %s1314_s0, 512 }
  0x17   :  { %p833_p8 = scmp.ne.s32.totalorder %s1314_s0, %s832_s19  ;;  %p836_p9 = scmp.lt.u32.totalorder %s832_s19, %s1314_s0 }
  0x19   :  { %p838_p10 = pnand %p836_p9, %p833_p8 }
  0x1b   :  { %841 = shalt.err (!%p838_p10)
}
  0x1c   :  { %s842_s24 = scalar_lea.vmem %s1023_s27, 512  ;;  %p847_p12 = scmp.lt.s32.totalorder %s1023_s27, %s1023_s27 }
  0x1d   :  { %p843_p11 = scmp.ne.s32.totalorder %s1023_s27, %s842_s24  ;;  %p848_p13 = scmp.lt.s32.totalorder %s842_s24, %s842_s24 }
  0x1f   :  { %p849_p0 = por %p848_p13, %p847_p12 }
  0x21   :  { %p850_p1 = pnand %p849_p0, %p843_p11 }
  0x23   :  { %853 = shalt.err (!%p850_p1)
}
  0x24   :  { %29 = dma.hbm_to_vmem [thread:$0]  %s1314_s0, 512, %s1023_s27, [#allocation3], %s976_s13, %s976_s13, %s977_s14  }
  0x25   :  { %s978_s26 = smov [#allocation7]   ;;  %s979_s29 = smov [#allocation8]  }
  0x26   :  { %s47_s28 = sshll.u32 %s978_s26, 4  ;;  %s59_s30 = sshll.u32 %s979_s29, 4  ;;  %s48_s28 = int_to_ptr.vmem [resolvable:$true] %s47_s28  ;;  %s1060_s30 = int_to_ptr.vmem [resolvable:$true] %s59_s30 }
  0x27   :  { %s854_s10 = scalar_lea.hbm %s1316_s2, 512 }
  0x28   :  { %p855_p2 = scmp.ne.s32.totalorder %s1316_s2, %s854_s10  ;;  %p858_p3 = scmp.lt.u32.totalorder %s854_s10, %s1316_s2 }
  0x2a   :  { %p860_p4 = pnand %p858_p3, %p855_p2 }
  0x2c   :  { %863 = shalt.err (!%p860_p4)
}
  0x2d   :  { %s864_s0 = scalar_lea.vmem %s48_s28, 512  ;;  %p869_p6 = scmp.lt.s32.totalorder %s48_s28, %s48_s28 }
  0x2e   :  { %p865_p5 = scmp.ne.s32.totalorder %s48_s28, %s864_s0  ;;  %p870_p7 = scmp.lt.s32.totalorder %s864_s0, %s864_s0 }
  0x30   :  { %p871_p8 = por %p870_p7, %p869_p6 }
  0x32   :  { %p872_p9 = pnand %p871_p8, %p865_p5 }
  0x34   :  { %875 = shalt.err (!%p872_p9)
}
  0x35   :  { %53 = dma.hbm_to_vmem [thread:$0]  %s1316_s2, 512, %s48_s28, [#allocation6], %s976_s13, %s976_s13, %s977_s14  }
  0x36   :  { %s876_s20 = scalar_lea.hbm %s1317_s3, 1536 }
  0x37   :  { %p877_p10 = scmp.ne.s32.totalorder %s1317_s3, %s876_s20  ;;  %p880_p11 = scmp.lt.u32.totalorder %s876_s20, %s1317_s3 }
  0x39   :  { %p882_p12 = pnand %p880_p11, %p877_p10 }
  0x3b   :  { %885 = shalt.err (!%p882_p12)
}
  0x3c   :  { %s886_s1 = scalar_lea.vmem %s1060_s30, 1536  ;;  %p891_p0 = scmp.lt.s32.totalorder %s1060_s30, %s1060_s30 }
  0x3d   :  { %p887_p13 = scmp.ne.s32.totalorder %s1060_s30, %s886_s1  ;;  %p892_p1 = scmp.lt.s32.totalorder %s886_s1, %s886_s1 }
  0x3f   :  { %p893_p2 = por %p892_p1, %p891_p0 }
  0x41   :  { %p894_p3 = pnand %p893_p2, %p887_p13 }
  0x43   :  { %897 = shalt.err (!%p894_p3)
}
  0x44   :  { %65 = dma.hbm_to_vmem [thread:$0]  %s1317_s3, 1536, %s1060_s30, [#allocation9], %s976_s13, %s976_s13, %s977_s14  }
  0x45   :  { %964 = dma.done.wait [#allocation3], 512  }
  0x46   :  { %965 = vsyncadd [#allocation3], 4294966784 }
  0x47   :  { %966 = dma.done.wait [#allocation6], 1024  }
  0x48   :  { %967 = vsyncadd [#allocation6], 4294966272 }
  0x49   :  { %968 = dma.done.wait [#allocation9], 1536  }
  0x4a   :  { %969 = vsyncadd [#allocation9], 4294965760  ;;  %vm86_vm0 = vcmask 261120   ;;  %v82_v0 = vld [vmem:[#allocation2] sm:$0xff]  ;;  %v83_v1 = vld [vmem:[#allocation2 + $0x8] sm:$0xff]  ;;  %s980_s11 = smov [#allocation10]  }
  0x4b   :  { %v266_v2 = vld [vmem:[#allocation5] sm:$0xff]  ;;  %v87_v3 = vsel %vm86_vm0, %v82_v0, 0.0  ;;  %v90_v4 = vsel %vm86_vm0, %v83_v1, 0.0  ;;  %v267_v5 = vld [vmem:[#allocation5 + $0x8] sm:$0xff]  ;;  %v84_v8 = vld [vmem:[#allocation2 + $0x10] sm:$0xff]  ;;  %s621_s12 = sshll.u32 %s980_s11, 4  ;;  %s622_s12 = int_to_ptr.vmem [resolvable:$true] %s621_s12 }
  0x4c   :  { %88 = vadd.xlane.f32.xlu0 %v87_v3  ;;  %91 = vadd.xlane.f32.xlu1 %v90_v4  ;;  %v270_v6 = vsel %vm86_vm0, %v266_v2, 0.0  ;;  %v273_v7 = vsel %vm86_vm0, %v267_v5, 0.0  ;;  %v268_v9 = vld [vmem:[#allocation5 + $0x10] sm:$0xff]  ;;  %v93_v10 = vsel %vm86_vm0, %v84_v8, 0.0  ;;  %v85_v12 = vld [vmem:[#allocation2 + $0x18] sm:$0xff]  ;;  %v441_v16 = vld [vmem:[#allocation7] sm:$0xff]  ;;  %p903_p5 = scmp.lt.s32.totalorder %s622_s12, %s622_s12 }
  0x4d   :  { %v276_v11 = vsel %vm86_vm0, %v268_v9, 0.0  ;;  %v269_v13 = vld [vmem:[#allocation5 + $0x18] sm:$0xff]  ;;  %v96_v14 = vsel %vm86_vm0, %v85_v12, 0.0  ;;  %v443_v17 = vld [vmem:[#allocation7 + $0x10] sm:$0xff]  ;;  %v445_v18 = vsel %vm86_vm0, %v441_v16, 0.0  ;;  %v1107_v20 = vld [vmem:[#allocation7 + $0x8] sm:$0xff] }
  0x4e   :  { %v279_v15 = vsel %vm86_vm0, %v269_v13, 0.0  ;;  %v451_v19 = vsel %vm86_vm0, %v443_v17, 0.0  ;;  %v1109_v21 = vld [vmem:[#allocation7 + $0x18] sm:$0xff]  ;;  %v448_v22 = vsel %vm86_vm0, %v1107_v20, 0.0  ;;  %s981_s15 = smov [#allocation11]   ;;  %s898_s0 = scalar_lea.vmem %s622_s12, 512 }
  0x4f   :  { %v454_v23 = vsel %vm86_vm0, %v1109_v21, 0.0  ;;  %s633_s16 = sshll.u32 %s981_s15, 4  ;;  %p899_p4 = scmp.ne.s32.totalorder %s622_s12, %s898_s0  ;;  %s1253_s16 = int_to_ptr.vmem [resolvable:$true] %s633_s16 }
  0x50   :  { %271 = vadd.xlane.f32.xlu0 %v270_v6  ;;  %274 = vadd.xlane.f32.xlu1 %v273_v7  ;;  %p904_p6 = scmp.lt.s32.totalorder %s898_s0, %s898_s0 }
  0x52   :  { %p905_p7 = por %p904_p6, %p903_p5 }
  0x54   :  { %94 = vadd.xlane.f32.xlu0 %v93_v10  ;;  %277 = vadd.xlane.f32.xlu1 %v276_v11  ;;  %p906_p8 = pnand %p905_p7, %p899_p4 }
  0x58   :  { %97 = vadd.xlane.f32.xlu0 %v96_v14  ;;  %280 = vadd.xlane.f32.xlu1 %v279_v15 }
  0x5c   :  { %446 = vadd.xlane.f32.xlu0 %v445_v18  ;;  %452 = vadd.xlane.f32.xlu1 %v451_v19 }
  0x60   :  { %449 = vadd.xlane.f32.xlu0 %v448_v22  ;;  %455 = vadd.xlane.f32.xlu1 %v454_v23  ;;  %v158_v23 = vld [vmem:[#allocation8 + $0x10] sm:$0xff] }
  0xd9   :  { %v89_v24 = vpop.xlane.xlu0 %88  ;;  %v92_v25 = vpop.xlane.xlu1 %91 }
  0xda   :  { %v100_v26 = vmul.f32 0.03125, %v89_v24  ;;  %v101_v27 = vmul.f32 0.03125, %v92_v25  ;;  %v159_v24 = vld [vmem:[#allocation8 + $0x18] sm:$0xff] }
  0xdb   :  { %v753_v25 = vpack.c.bf16 %v159_v24, %v158_v23  ;;  %v508_v23 = vld [vmem:[#allocation8 + $0x50] sm:$0xff]  ;;  %v509_v24 = vld [vmem:[#allocation8 + $0x58] sm:$0xff] }
  0xdc   :  { %v1115_v28 = vsub.f32 %v82_v0, %v100_v26  ;;  %v1117_v29 = vsub.f32 %v83_v1, %v101_v27  ;;  %v331_v26 = vld [vmem:[#allocation8 + $0x20] sm:$0xff]  ;;  %v332_v27 = vld [vmem:[#allocation8 + $0x28] sm:$0xff] }
  0xdd   :  { %v272_v30 = vpop.xlane.xlu0 %271  ;;  %v275_v31 = vpop.xlane.xlu1 %274 }
  0xde   :  { %v282_v32 = vmul.f32 0.03125, %v272_v30  ;;  %v283_v33 = vmul.f32 0.03125, %v275_v31  ;;  %v108_v34 = vmul.f32 %v1115_v28, %v1115_v28  ;;  %v109_v35 = vmul.f32 %v1117_v29, %v1117_v29  ;;  %v333_v31 = vld [vmem:[#allocation8 + $0x30] sm:$0xff] }
  0xdf   :  { %v757_v30 = vpack.c.bf16 %v332_v27, %v331_v26 }
  0xe0   :  { %v1123_v36 = vsub.f32 %v266_v2, %v282_v32  ;;  %v1125_v37 = vsub.f32 %v267_v5, %v283_v33  ;;  %v112_v38 = vsel %vm86_vm0, %v108_v34, 0.0  ;;  %v115_v41 = vsel %vm86_vm0, %v109_v35, 0.0  ;;  %v334_v32 = vld [vmem:[#allocation8 + $0x38] sm:$0xff]  ;;  %v506_v34 = vld [vmem:[#allocation8 + $0x40] sm:$0xff]  ;;  %v507_v35 = vld [vmem:[#allocation8 + $0x48] sm:$0xff] }
  0xe1   :  { %113 = vadd.xlane.f32.xlu0 %v112_v38  ;;  %v95_v39 = vpop.xlane.xlu0 %94  ;;  %v278_v40 = vpop.xlane.xlu1 %277  ;;  %758 = vmatprep.subr.bf16.mxu1 %v757_v30  ;;  %v761_v33 = vpack.c.bf16 %v334_v32, %v333_v31  ;;  %v1177_v38 = vpack.c.bf16 %v507_v35, %v506_v34  ;;  %v769_v35 = vpack.c.bf16 %v509_v24, %v508_v23 }
  0xe2   :  { %v102_v42 = vmul.f32 0.03125, %v95_v39  ;;  %v284_v43 = vmul.f32 0.03125, %v278_v40  ;;  %v290_v44 = vmul.f32 %v1123_v36, %v1123_v36  ;;  %v291_v45 = vmul.f32 %v1125_v37, %v1125_v37  ;;  %760 = vmatpush3.bf16.msra.mxu1 %v757_v30 }
  0xe3   :  { %762 = vmatprep.subr.bf16.mxu1 %v761_v33 }
  0xe4   :  { %v1133_v46 = vsub.f32 %v84_v8, %v102_v42  ;;  %v1135_v47 = vsub.f32 %v268_v9, %v284_v43  ;;  %v294_v48 = vsel %vm86_vm0, %v290_v44, 0.0  ;;  %v297_v51 = vsel %vm86_vm0, %v291_v45, 0.0 }
  0xe5   :  { %116 = vadd.xlane.f32.xlu0 %v115_v41  ;;  %295 = vadd.xlane.f32.xlu1 %v294_v48  ;;  %v98_v49 = vpop.xlane.xlu0 %97  ;;  %v281_v50 = vpop.xlane.xlu1 %280 }
  0xe6   :  { %v103_v52 = vmul.f32 0.03125, %v98_v49  ;;  %v285_v53 = vmul.f32 0.03125, %v281_v50  ;;  %v110_v54 = vmul.f32 %v1133_v46, %v1133_v46  ;;  %v292_v55 = vmul.f32 %v1135_v47, %v1135_v47  ;;  %764 = vmatpush3.bf16.msra.mxu1 %v761_v33 }
  0xe7   :  { %773 = vmatprep.subr.bf16.mxu1 %v1177_v38 }
  0xe8   :  { %v1143_v56 = vsub.f32 %v85_v12, %v103_v52  ;;  %v1145_v57 = vsub.f32 %v269_v13, %v285_v53  ;;  %v118_v58 = vsel %vm86_vm0, %v110_v54, 0.0  ;;  %v300_v61 = vsel %vm86_vm0, %v292_v55, 0.0 }
  0xe9   :  { %298 = vadd.xlane.f32.xlu1 %v297_v51  ;;  %119 = vadd.xlane.f32.xlu0 %v118_v58  ;;  %v447_v59 = vpop.xlane.xlu0 %446  ;;  %v453_v60 = vpop.xlane.xlu1 %452 }
  0xea   :  { %v457_v62 = vmul.f32 0.03125, %v447_v59  ;;  %v459_v63 = vmul.f32 0.03125, %v453_v60  ;;  %v111_v0 = vmul.f32 %v1143_v56, %v1143_v56  ;;  %v293_v1 = vmul.f32 %v1145_v57, %v1145_v57 }
  0xec   :  { %v1153_v2 = vsub.f32 %v441_v16, %v457_v62  ;;  %v1155_v3 = vsub.f32 %v443_v17, %v459_v63  ;;  %v121_v4 = vsel %vm86_vm0, %v111_v0, 0.0  ;;  %v303_v7 = vsel %vm86_vm0, %v293_v1, 0.0  ;;  %v1184_v1 = vld [vmem:[%s1318_s4] ss:$0 sm:$0xff] }
  0xed   :  { %301 = vadd.xlane.f32.xlu1 %v300_v61  ;;  %122 = vadd.xlane.f32.xlu0 %v121_v4  ;;  %v450_v5 = vpop.xlane.xlu0 %449  ;;  %v456_v6 = vpop.xlane.xlu1 %455 }
  0xee   :  { %v458_v8 = vmul.f32 0.03125, %v450_v5  ;;  %v460_v9 = vmul.f32 0.03125, %v456_v6  ;;  %v465_v10 = vmul.f32 %v1153_v2, %v1153_v2  ;;  %v467_v11 = vmul.f32 %v1155_v3, %v1155_v3 }
  0xf0   :  { %v1164_v12 = vsub.f32 %v1107_v20, %v458_v8  ;;  %v1167_v13 = vsub.f32 %v1109_v21, %v460_v9  ;;  %v469_v14 = vsel %vm86_vm0, %v465_v10, 0.0  ;;  %v475_v15 = vsel %vm86_vm0, %v467_v11, 0.0  ;;  %v156_v20 = vld [vmem:[#allocation8] sm:$0xff]  ;;  %v157_v21 = vld [vmem:[#allocation8 + $0x8] sm:$0xff] }
  0xf1   :  { %304 = vadd.xlane.f32.xlu1 %v303_v7  ;;  %470 = vadd.xlane.f32.xlu0 %v469_v14  ;;  %v749_v22 = vpack.c.bf16 %v157_v21, %v156_v20  ;;  %v1190_v9 = vld [vmem:[%s1318_s4 + $0x1] ss:$0 sm:$0xff] }
  0xf2   :  { %v466_v16 = vmul.f32 %v1164_v12, %v1164_v12  ;;  %v468_v17 = vmul.f32 %v1167_v13, %v1167_v13 }
  0xf3   :  { %750 = vmatprep.subr.bf16.mxu0 %v749_v22 }
  0xf4   :  { %v472_v18 = vsel %vm86_vm0, %v466_v16, 0.0  ;;  %v478_v19 = vsel %vm86_vm0, %v468_v17, 0.0  ;;  %752 = vmatpush3.bf16.msra.mxu0 %v749_v22 }
  0xf5   :  { %476 = vadd.xlane.f32.xlu1 %v475_v15  ;;  %473 = vadd.xlane.f32.xlu0 %v472_v18 }
  0xf6   :  { %754 = vmatprep.subr.bf16.mxu0 %v753_v25 }
  0xf8   :  { %756 = vmatpush3.bf16.msra.mxu0 %v753_v25 }
  0xf9   :  { %479 = vadd.xlane.f32.xlu1 %v478_v19  ;;  %766 = vmatprep.subr.bf16.mxu0 %v1177_v38 }
 0x16e   :  { %v114_v39 = vpop.xlane.xlu0 %113 }
 0x16f   :  { %v124_v40 = vmul.f32 0.03125, %v114_v39 }
 0x171   :  { %v128_v41 = vadd.f32 1e-05, %v124_v40 }
 0x172   :  { %v296_v42 = vpop.xlane.xlu1 %295  ;;  %v117_v43 = vpop.xlane.xlu0 %116 }
 0x173   :  { %786 = vrsqrt.f32 %v128_v41  ;;  %v306_v44 = vmul.f32 0.03125, %v296_v42  ;;  %v125_v45 = vmul.f32 0.03125, %v117_v43 }
 0x175   :  { %v310_v48 = vadd.f32 1e-05, %v306_v44  ;;  %v129_v49 = vadd.f32 1e-05, %v125_v45 }
 0x176   :  { %v299_v50 = vpop.xlane.xlu1 %298  ;;  %v120_v51 = vpop.xlane.xlu0 %119 }
 0x177   :  { %788 = vrsqrt.f32 %v310_v48  ;;  %v307_v52 = vmul.f32 0.03125, %v299_v50  ;;  %v126_v53 = vmul.f32 0.03125, %v120_v51 }
 0x178   :  { %790 = vrsqrt.f32 %v129_v49 }
 0x179   :  { %v311_v54 = vadd.f32 1e-05, %v307_v52  ;;  %v130_v55 = vadd.f32 1e-05, %v126_v53 }
 0x17a   :  { %v302_v58 = vpop.xlane.xlu1 %301  ;;  %v123_v59 = vpop.xlane.xlu0 %122 }
 0x17b   :  { %792 = vrsqrt.f32 %v311_v54  ;;  %v308_v60 = vmul.f32 0.03125, %v302_v58  ;;  %v127_v61 = vmul.f32 0.03125, %v123_v59 }
 0x17c   :  { %794 = vrsqrt.f32 %v130_v55 }
 0x17d   :  { %v787_v62 = vpop.eup %786  ;;  %v312_v63 = vadd.f32 1e-05, %v308_v60  ;;  %v131_v0 = vadd.f32 1e-05, %v127_v61 }
 0x17e   :  { %v305_v4 = vpop.xlane.xlu1 %304  ;;  %v471_v5 = vpop.xlane.xlu0 %470  ;;  %v136_v6 = vmul.f32 %v787_v62, %v1115_v28 }
 0x17f   :  { %796 = vrsqrt.f32 %v312_v63  ;;  %v309_v7 = vmul.f32 0.03125, %v305_v4  ;;  %v481_v8 = vmul.f32 0.03125, %v471_v5 }
 0x180   :  { %798 = vrsqrt.f32 %v131_v0  ;;  %v144_v10 = vmul.f32 %v1184_v1, %v136_v6 }
 0x181   :  { %v789_v11 = vpop.eup %788  ;;  %v313_v14 = vadd.f32 1e-05, %v309_v7  ;;  %v485_v15 = vadd.f32 1e-05, %v481_v8  ;;  %v668_v8 = vld [vmem:[%s1318_s4 + $0x2] ss:$0 sm:$0xff] }
 0x182   :  { %v791_v16 = vpop.eup %790  ;;  %v477_v17 = vpop.xlane.xlu1 %476  ;;  %v152_v19 = vadd.f32 %v1190_v9, %v144_v10  ;;  %v318_v28 = vmul.f32 %v789_v11, %v1123_v36 }
 0x183   :  { %v474_v18 = vpop.xlane.xlu0 %473  ;;  %800 = vrsqrt.f32 %v313_v14  ;;  %v483_v20 = vmul.f32 0.03125, %v477_v17  ;;  %v137_v22 = vmul.f32 %v791_v16, %v1117_v29  ;;  %v673_v14 = vld [vmem:[%s1318_s4 + $0x3] ss:$0 sm:$0xff] }
 0x184   :  { %v482_v21 = vmul.f32 0.03125, %v474_v18  ;;  %802 = vrsqrt.f32 %v485_v15  ;;  %715 = vmatprep.mubr.msk.f32.mxu0 %vm86_vm0, %v152_v19  ;;  %v322_v25 = vmul.f32 %v1184_v1, %v318_v28 }
 0x185   :  { %v793_v26 = vpop.eup %792  ;;  %v487_v27 = vadd.f32 1e-05, %v483_v20  ;;  %v145_v31 = vmul.f32 %v1184_v1, %v137_v22 }
 0x186   :  { %v486_v30 = vadd.f32 1e-05, %v482_v21  ;;  %v795_v32 = vpop.eup %794  ;;  %v480_v33 = vpop.xlane.xlu1 %479  ;;  %v326_v36 = vadd.f32 %v1190_v9, %v322_v25  ;;  %v319_v34 = vmul.f32 %v793_v26, %v1125_v37 }
 0x187   :  { %804 = vrsqrt.f32 %v487_v27  ;;  %v484_v29 = vmul.f32 0.03125, %v480_v33  ;;  %v153_v39 = vadd.f32 %v1190_v9, %v145_v31  ;;  %v138_v40 = vmul.f32 %v795_v32, %v1133_v46 }
 0x188   :  { %806 = vrsqrt.f32 %v486_v30  ;;  %729 = vmatprep.mubr.msk.f32.mxu1 %vm86_vm0, %v326_v36  ;;  %v323_v41 = vmul.f32 %v1184_v1, %v319_v34 }
 0x189   :  { %v797_v42 = vpop.eup %796  ;;  %v488_v43 = vadd.f32 1e-05, %v484_v29  ;;  %716 = vmatmul.mubr.msk.f32.vlgmr.msra.gmra.mrb[0].mxu0 %vm86_vm0, %v153_v39  ;;  %v146_v44 = vmul.f32 %v1184_v1, %v138_v40 }
 0x18a   :  { %v799_v45 = vpop.eup %798  ;;  %v327_v37 = vadd.f32 %v1190_v9, %v323_v41  ;;  %v320_v48 = vmul.f32 %v797_v42, %v1135_v47  ;;  %768 = vmatpush3.bf16.msra.mxu0 %v1177_v38 }
 0x18b   :  { %808 = vrsqrt.f32 %v488_v43  ;;  %v154_v46 = vadd.f32 %v1190_v9, %v146_v44  ;;  %v139_v49 = vmul.f32 %v799_v45, %v1143_v56  ;;  %770 = vmatprep.subr.bf16.mxu0 %v769_v35 }
 0x18c   :  { %730 = vmatmul.mubr.msk.f32.vlgmr.msra.gmra.mrb[0].mxu1 %vm86_vm0, %v327_v37  ;;  %v324_v50 = vmul.f32 %v1184_v1, %v320_v48 }
 0x18d   :  { %v801_v51 = vpop.eup %800  ;;  %718 = vmatprep.mubr.msk.f32.mxu0 %vm86_vm0, %v154_v46  ;;  %v147_v52 = vmul.f32 %v1184_v1, %v139_v49  ;;  %775 = vmatpush3.bf16.msra.mxu1 %v1177_v38 }
 0x18e   :  { %v803_v47 = vpop.eup %802  ;;  %v328_v53 = vadd.f32 %v1190_v9, %v324_v50  ;;  %v321_v54 = vmul.f32 %v801_v51, %v1145_v57  ;;  %772 = vmatpush3.bf16.msra.mxu0 %v769_v35  ;;  %774 = vmatprep.subr.bf16.mxu1 %v769_v35 }
 0x18f   :  { %v155_v56 = vadd.f32 %v1190_v9, %v147_v52  ;;  %v493_v55 = vmul.f32 %v803_v47, %v1153_v2 }
 0x190   :  { %732 = vmatprep.mubr.msk.f32.mxu1 %vm86_vm0, %v328_v53  ;;  %v325_v58 = vmul.f32 %v1184_v1, %v321_v54 }
 0x191   :  { %v805_v59 = vpop.eup %804  ;;  %719 = vmatmul.mubr.msk.f32.gmra.mrb[2].mxu0 %vm86_vm0, %v155_v56  ;;  %v497_v38 = vmul.f32 %v1184_v1, %v493_v55  ;;  %776 = vmatpush3.bf16.msra.mxu1 %v769_v35 }
 0x192   :  { %v807_v60 = vpop.eup %806  ;;  %v329_v61 = vadd.f32 %v1190_v9, %v325_v58  ;;  %v495_v57 = vmul.f32 %v805_v59, %v1155_v3 }
 0x193   :  { %v494_v62 = vmul.f32 %v807_v60, %v1164_v12  ;;  %v501_v63 = vadd.f32 %v1190_v9, %v497_v38 }
 0x194   :  { %733 = vmatmul.mubr.msk.f32.gmra.mrb[2].mxu1 %vm86_vm0, %v329_v61  ;;  %v499_v2 = vmul.f32 %v1184_v1, %v495_v57 }
 0x195   :  { %v809_v0 = vpop.eup %808  ;;  %v498_v4 = vmul.f32 %v1184_v1, %v494_v62  ;;  %743 = vmatprep.mubr.msk.f32.mxu0 %vm86_vm0, %v501_v63 }
 0x196   :  { %v496_v5 = vmul.f32 %v809_v0, %v1167_v13  ;;  %v503_v6 = vadd.f32 %v1190_v9, %v499_v2 }
 0x197   :  { %v502_v7 = vadd.f32 %v1190_v9, %v498_v4 }
 0x198   :  { %v500_v3 = vmul.f32 %v1184_v1, %v496_v5  ;;  %746 = vmatprep.mubr.msk.f32.mxu1 %vm86_vm0, %v503_v6 }
 0x199   :  { %744 = vmatmul.mubr.msk.f32.vlgmr.msra.gmra.mrb[4].mxu0 %vm86_vm0, %v502_v7 }
 0x19a   :  { %v504_v12 = vadd.f32 %v1190_v9, %v500_v3 }
 0x19c   :  { %747 = vmatmul.mubr.msk.f32.vlgmr.msra.gmra.mrb[4].mxu1 %vm86_vm0, %v504_v12 }
 0x25c   :  { %v717_v10 = vpop.f32.mrb[0].mxu0 }
 0x25d   :  { %v249_v13 = vadd.f32 %v717_v10, %v668_v8  ;;  %v243_v11 = vpop.f32.mrb[1].mxu0 }
 0x25e   :  { %v244_v1 = vadd.f32 %v668_v8, %v243_v11 }
 0x25f   :  { %263 = vst.msk [vmem:[#allocation10 + $0x8] sm:$0xff] %vm86_vm0, %v249_v13  ;;  %v731_v15 = vpop.f32.mrb[0].mxu1 }
 0x260   :  { %262 = vst.msk [vmem:[#allocation10] sm:$0xff] %vm86_vm0, %v244_v1  ;;  %v424_v9 = vadd.f32 %v731_v15, %v673_v14  ;;  %v418_v16 = vpop.f32.mrb[1].mxu1 }
 0x261   :  { %v419_v17 = vadd.f32 %v673_v14, %v418_v16 }
 0x262   :  { %438 = vst.msk [vmem:[#allocation11 + $0x8] sm:$0xff] %vm86_vm0, %v424_v9 }
 0x263   :  { %437 = vst.msk [vmem:[#allocation11] sm:$0xff] %vm86_vm0, %v419_v17 }
 0x264   :  { %v720_v18 = vpop.f32.mrb[2].mxu0 }
 0x265   :  { %v259_v19 = vadd.f32 %v720_v18, %v668_v8  ;;  %v253_v28 = vpop.f32.mrb[3].mxu0 }
 0x266   :  { %v254_v20 = vadd.f32 %v668_v8, %v253_v28 }
 0x267   :  { %265 = vst.msk [vmem:[#allocation10 + $0x18] sm:$0xff] %vm86_vm0, %v259_v19  ;;  %v734_v21 = vpop.f32.mrb[2].mxu1 }
 0x268   :  { %264 = vst.msk [vmem:[#allocation10 + $0x10] sm:$0xff] %vm86_vm0, %v254_v20  ;;  %v434_v22 = vadd.f32 %v734_v21, %v673_v14  ;;  %v428_v23 = vpop.f32.mrb[3].mxu1 }
 0x269   :  { %v429_v24 = vadd.f32 %v673_v14, %v428_v23 }
 0x26a   :  { %909 = shalt.err (!%p906_p8)
}
 0x26b   :  { %s910_s18 = scalar_lea.hbm %s1319_s5, 512 }
 0x26c   :  { %p911_p9 = scmp.ne.s32.totalorder %s1319_s5, %s910_s18  ;;  %p914_p10 = scmp.lt.u32.totalorder %s910_s18, %s1319_s5 }
 0x26e   :  { %p916_p11 = pnand %p914_p10, %p911_p9 }
 0x270   :  { %919 = shalt.err (!%p916_p11)
}
 0x271   :  { %627 = dma.vmem_to_hbm [thread:$0]  %s622_s12, 512, %s1319_s5, [#allocation4], %s976_s13, %s976_s13, %s977_s14   ;;  %440 = vst.msk [vmem:[#allocation11 + $0x18] sm:$0xff] %vm86_vm0, %v434_v22  ;;  %439 = vst.msk [vmem:[#allocation11 + $0x10] sm:$0xff] %vm86_vm0, %v429_v24  ;;  %v745_v26 = vpop.f32.mrb[4].mxu0 }
 0x272   :  { %v678_v25 = vld [vmem:[%s1318_s4 + $0x4] ss:$0 sm:$0xff]  ;;  %s920_s25 = scalar_lea.vmem %s1253_s16, 512  ;;  %p925_p13 = scmp.lt.s32.totalorder %s1253_s16, %s1253_s16 }
 0x273   :  { %p921_p12 = scmp.ne.s32.totalorder %s1253_s16, %s920_s25  ;;  %p926_p0 = scmp.lt.s32.totalorder %s920_s25, %s920_s25 }
 0x275   :  { %p927_p1 = por %p926_p0, %p925_p13 }
 0x277   :  { %p928_p2 = pnand %p927_p1, %p921_p12 }
 0x279   :  { %931 = shalt.err (!%p928_p2)
}
 0x27a   :  { %s932_s5 = scalar_lea.hbm %s1320_s6, 512 }
 0x27b   :  { %p933_p3 = scmp.ne.s32.totalorder %s1320_s6, %s932_s5  ;;  %p936_p4 = scmp.lt.u32.totalorder %s932_s5, %s1320_s6 }
 0x27d   :  { %p938_p5 = pnand %p936_p4, %p933_p3 }
 0x27f   :  { %941 = shalt.err (!%p938_p5)
}
 0x280   :  { %639 = dma.vmem_to_hbm [thread:$0]  %s1253_s16, 512, %s1320_s6, [#allocation12], %s976_s13, %s976_s13, %s977_s14   ;;  %v599_v27 = vadd.f32 %v745_v26, %v678_v25  ;;  %v593_v30 = vpop.f32.mrb[5].mxu0  ;;  %v748_v32 = vpop.f32.mrb[4].mxu1 }
 0x281   :  { %v594_v31 = vadd.f32 %v678_v25, %v593_v30  ;;  %s982_s10 = smov [#allocation13]   ;;  %v609_v33 = vadd.f32 %v748_v32, %v678_v25  ;;  %v603_v36 = vpop.f32.mrb[5].mxu1 }
 0x282   :  { %s645_s11 = sshll.u32 %s982_s10, 4  ;;  %613 = vst.msk [vmem:[#allocation13 + $0x8] sm:$0xff] %vm86_vm0, %v599_v27  ;;  %v604_v34 = vadd.f32 %v678_v25, %v603_v36  ;;  %s646_s11 = int_to_ptr.vmem [resolvable:$true] %s645_s11 }
 0x283   :  { %612 = vst.msk [vmem:[#allocation13] sm:$0xff] %vm86_vm0, %v594_v31  ;;  %615 = vst.msk [vmem:[#allocation13 + $0x18] sm:$0xff] %vm86_vm0, %v609_v33  ;;  %s942_s12 = scalar_lea.vmem %s646_s11, 512  ;;  %p947_p7 = scmp.lt.s32.totalorder %s646_s11, %s646_s11 }
 0x284   :  { %614 = vst.msk [vmem:[#allocation13 + $0x10] sm:$0xff] %vm86_vm0, %v604_v34  ;;  %p943_p6 = scmp.ne.s32.totalorder %s646_s11, %s942_s12  ;;  %p948_p8 = scmp.lt.s32.totalorder %s942_s12, %s942_s12 }
 0x286   :  { %p949_p9 = por %p948_p8, %p947_p7 }
 0x288   :  { %p950_p10 = pnand %p949_p9, %p943_p6 }
 0x28a   :  { %953 = shalt.err (!%p950_p10)
}
 0x28b   :  { %s954_s16 = scalar_lea.hbm %s1321_s7, 512 }
 0x28c   :  { %p955_p11 = scmp.ne.s32.totalorder %s1321_s7, %s954_s16  ;;  %p958_p12 = scmp.lt.u32.totalorder %s954_s16, %s1321_s7 }
 0x28e   :  { %p960_p13 = pnand %p958_p12, %p955_p11 }
 0x290   :  { %963 = shalt.err (!%p960_p13)
}
 0x291   :  { %651 = dma.vmem_to_hbm [thread:$0]  %s646_s11, 512, %s1321_s7, [#allocation12], %s976_s13, %s976_s13, %s977_s14  }
 0x292   :  { %970 = dma.done.wait [#allocation4], 512  }
 0x293   :  { %971 = vsyncadd [#allocation4], 4294966784 }
 0x294   :  { %972 = dma.done.wait [#allocation12], 1024  }
 0x295   :  { %973 = vsyncadd [#allocation12], 4294966272 }
 0x296   :  { %661 = vsyncpa [#allocation3], 1 }
 0x297   :  { %662 = vsyncpa [#allocation6], 1 }
 0x298   :  { %663 = vsyncpa [#allocation9], 1 }
 0x299   :  { %664 = vsyncpa [#allocation4], 1 }
 0x29a   :  { %665 = vsyncpa [#allocation12], 1 }

</bundles_post_ra>
